<compile_context>
chip_gen: v6e
topology: v6e:2x2x1
jax: 0.10.0
libtpu: 0.0.40
codegen_flags: <defaults>
</compile_context>

<pallas_src>
import jax
import jax.numpy as jnp
from jax.experimental import pallas as pl
from jax.experimental.pallas import tpu as pltpu

NOUT_PAD = 128  # lane-dense padded width for the 1-wide output head


def _round_up(x, m):
    return ((x + m - 1) // m) * m


# ----------------------------------------------------------------------------
# Fused Pallas kernel: hidden matmul + bias + relu + out matmul + bias + sigmoid
# ----------------------------------------------------------------------------
def _linear_head_kernel(x_ref, w1_ref, b1_ref, w2_ref, b2_ref, o_ref):
    # hidden = relu(x @ W1 + b1)   (bf16 operands, f32 accumulation)
    h = jnp.dot(x_ref[...], w1_ref[...], preferred_element_type=jnp.float32)
    h = jnp.maximum(h + b1_ref[...], 0.0)
    # out = sigmoid(hidden @ W2 + b2)   (W2 zero-padded to 128 output lanes)
    o = jnp.dot(h.astype(w2_ref.dtype), w2_ref[...],
                preferred_element_type=jnp.float32)
    o = o + b2_ref[...]
    o_ref[...] = (1.0 / (1.0 + jnp.exp(-o))).astype(o_ref.dtype)


# ----------------------------------------------------------------------------
# Wrapper: padding / tiling / pallas_call plumbing
# ----------------------------------------------------------------------------
def linear_head_forward(x, params, *, tm=256, compute_dtype=jnp.bfloat16):
    """x: (M, 512) f32 -> (M, 1) f32."""
    M, K = x.shape
    w1, b1 = params["w1"], params["b1"]      # (512, H), (H,)   matmul layout
    w2, b2 = params["w2"], params["b2"]      # (H, 1),   (1,)
    assert w1.shape[0] == K
    H = w1.shape[1]

    # Pad hidden dim to a multiple of 128 (exact: zero cols of W1 -> relu(0+0)=0,
    # zero rows of W2 contribute nothing).
    Hp = _round_up(H, 128)
    if Hp != H:
        w1 = jnp.pad(w1, ((0, 0), (0, Hp - H)))
        b1 = jnp.pad(b1, (0, Hp - H))
        w2 = jnp.pad(w2, ((0, Hp - H), (0, 0)))

    # Pad the 1-wide head to 128 lanes for dense stores / full MXU tiles.
    w2 = jnp.pad(w2, ((0, 0), (0, NOUT_PAD - w2.shape[1])))
    b2 = jnp.pad(b2, (0, NOUT_PAD - b2.shape[0]))

    # cdiv/pad-based M tiling (never fall back to tm = M for awkward M).
    Mp = _round_up(M, 8)
    if Mp <= tm:
        tm = Mp
    else:
        Mp = _round_up(M, tm)

    xp = x.astype(compute_dtype)
    if Mp != M:
        xp = jnp.pad(xp, ((0, Mp - M), (0, 0)))
    w1c = w1.astype(compute_dtype)
    w2c = w2.astype(compute_dtype)
    b1r = b1.reshape(1, Hp).astype(jnp.float32)
    b2r = b2.reshape(1, NOUT_PAD).astype(jnp.float32)

    out_p = pl.pallas_call(
        _linear_head_kernel,
        out_shape=jax.ShapeDtypeStruct((Mp, NOUT_PAD), jnp.float32),
        grid=(Mp // tm,),
        in_specs=[
            pl.BlockSpec((tm, K), lambda i: (i, 0)),           # x tile
            pl.BlockSpec((K, Hp), lambda i: (0, 0)),           # W1 (resident)
            pl.BlockSpec((1, Hp), lambda i: (0, 0)),           # b1
            pl.BlockSpec((Hp, NOUT_PAD), lambda i: (0, 0)),    # W2 (resident)
            pl.BlockSpec((1, NOUT_PAD), lambda i: (0, 0)),     # b2
        ],
        out_specs=pl.BlockSpec((tm, NOUT_PAD), lambda i: (i, 0)),
        compiler_params=pltpu.CompilerParams(
            dimension_semantics=("parallel",)),
    )(xp, w1c, b1r, w2c, b2r)

    return out_p[:M, :1]


# ----------------------------------------------------------------------------
# Parameters (mimic PyTorch: kaiming_normal_(mode='fan_out'), bias = 0.01),
# converted from torch (out, in) layout to matmul (in, out) layout.
# ----------------------------------------------------------------------------
def make_linear_head_params(key, mlp_dim, in_dim=512):
    k1, k2 = jax.random.split(key, 2)
    # nn.Linear weight is (out, in); kaiming fan_out = out_features; gain = sqrt(2)
    w1_t = jax.random.normal(k1, (mlp_dim, in_dim)) * jnp.sqrt(2.0 / mlp_dim)
    w2_t = jax.random.normal(k2, (1, mlp_dim)) * jnp.sqrt(2.0 / 1.0)
    return {
        "w1": jnp.transpose(w1_t).astype(jnp.float32),          # (512, mlp_dim)
        "b1": jnp.full((mlp_dim,), 0.01, dtype=jnp.float32),
        "w2": jnp.transpose(w2_t).astype(jnp.float32),           # (mlp_dim, 1)
        "b2": jnp.full((1,), 0.01, dtype=jnp.float32),
    }


# ----------------------------------------------------------------------------
# Pure-JAX f32 reference (same math, no Pallas)
# ----------------------------------------------------------------------------
def linear_head_reference(x, params):
    h = jnp.maximum(x @ params["w1"] + params["b1"][None, :], 0.0)
    o = h @ params["w2"] + params["b2"][None, :]
    return 1.0 / (1.0 + jnp.exp(-o))


# ----------------------------------------------------------------------------
# Demo
# ----------------------------------------------------------------------------
if __name__ == "__main__":
    key = jax.random.PRNGKey(0)

    configs = [
        # (batch, MLP_dim) — second config exercises M-pad and hidden-pad paths
        (16, 128),
        (5, 96),
    ]

    ok = True
    for idx, (batch, mlp_dim) in enumerate(configs):
        kx, kp, key = jax.random.split(key, 3)
        x = jax.random.normal(kx, (batch, 512), dtype=jnp.float32)
        params = make_linear_head_params(kp, mlp_dim)

        got = linear_head_forward(x, params)
        ref = linear_head_reference(x, params)

        got = jax.block_until_ready(got)
        ref = jax.block_until_ready(ref)

        if got.shape != ref.shape or not bool(
                jnp.allclose(got, ref, atol=2e-2, rtol=2e-2)):
            ok = False
            print(f"config {idx}: MISMATCH shape={got.shape} vs {ref.shape} "
                  f"max_err={float(jnp.max(jnp.abs(got - ref)))}")

    if ok:
        print("KERNEL_OK")
</pallas_src>

<mosaic_0001>
module attributes {stable_mosaic.version = 11 : i64} {
  func.func @_linear_head_kernel(%arg0: i32, %arg1: memref<16x512xbf16, #tpu.memory_space<vmem>>, %arg2: memref<512x128xbf16, #tpu.memory_space<vmem>>, %arg3: memref<1x128xf32, #tpu.memory_space<vmem>>, %arg4: memref<128x128xbf16, #tpu.memory_space<vmem>>, %arg5: memref<1x128xf32, #tpu.memory_space<vmem>>, %arg6: memref<16x128xf32, #tpu.memory_space<vmem>>) attributes {dimension_semantics = [#tpu.dimension_semantics<parallel>], iteration_bounds = array<i64: 1>, scalar_prefetch = 0 : i64, scratch_operands = 0 : i64, tpu.core_type = #tpu.core_type<tc>, window_params = [{transform_indices = @transform_0, window_bounds = array<i64: 16, 512>}, {pipeline_mode = #tpu.pipeline_mode<synchronous>, transform_indices = @transform_1, window_bounds = array<i64: 512, 128>}, {pipeline_mode = #tpu.pipeline_mode<synchronous>, transform_indices = @transform_2, window_bounds = array<i64: 1, 128>}, {pipeline_mode = #tpu.pipeline_mode<synchronous>, transform_indices = @transform_3, window_bounds = array<i64: 128, 128>}, {pipeline_mode = #tpu.pipeline_mode<synchronous>, transform_indices = @transform_4, window_bounds = array<i64: 1, 128>}, {transform_indices = @transform_5, window_bounds = array<i64: 16, 128>}]} {
    %c0 = arith.constant 0 : index
    %c0_0 = arith.constant 0 : index
    %0 = vector.load %arg1[%c0, %c0_0] : memref<16x512xbf16, #tpu.memory_space<vmem>>, vector<16x512xbf16>
    %c0_1 = arith.constant 0 : index
    %c0_2 = arith.constant 0 : index
    %1 = vector.load %arg2[%c0_1, %c0_2] : memref<512x128xbf16, #tpu.memory_space<vmem>>, vector<512x128xbf16>
    %cst = arith.constant dense<0.000000e+00> : vector<16x128xf32>
    %2 = tpu.matmul %0, %1, %cst {dimension_numbers = #tpu.dot_dimension_numbers<[1], [0], [0], [1], [0, 0, 1, 1], [], []>} : vector<16x512xbf16>, vector<512x128xbf16>, vector<16x128xf32> -> vector<16x128xf32>
    %c0_3 = arith.constant 0 : index
    %c0_4 = arith.constant 0 : index
    %3 = vector.load %arg3[%c0_3, %c0_4] : memref<1x128xf32, #tpu.memory_space<vmem>>, vector<1x128xf32>
    %4 = vector.broadcast %3 : vector<1x128xf32> to vector<16x128xf32>
    %5 = arith.addf %2, %4 : vector<16x128xf32>
    %cst_5 = arith.constant 0.000000e+00 : f32
    %6 = vector.broadcast %cst_5 : f32 to vector<16x128xf32>
    %7 = arith.maximumf %5, %6 : vector<16x128xf32>
    %8 = arith.truncf %7 : vector<16x128xf32> to vector<16x128xbf16>
    %c0_6 = arith.constant 0 : index
    %c0_7 = arith.constant 0 : index
    %9 = vector.load %arg4[%c0_6, %c0_7] : memref<128x128xbf16, #tpu.memory_space<vmem>>, vector<128x128xbf16>
    %cst_8 = arith.constant dense<0.000000e+00> : vector<16x128xf32>
    %10 = tpu.matmul %8, %9, %cst_8 {dimension_numbers = #tpu.dot_dimension_numbers<[1], [0], [0], [1], [0, 0, 1, 1], [], []>} : vector<16x128xbf16>, vector<128x128xbf16>, vector<16x128xf32> -> vector<16x128xf32>
    %c0_9 = arith.constant 0 : index
    %c0_10 = arith.constant 0 : index
    %11 = vector.load %arg5[%c0_9, %c0_10] : memref<1x128xf32, #tpu.memory_space<vmem>>, vector<1x128xf32>
    %12 = vector.broadcast %11 : vector<1x128xf32> to vector<16x128xf32>
    %13 = arith.addf %10, %12 : vector<16x128xf32>
    %cst_11 = arith.constant 0.000000e+00 : f32
    %14 = vector.broadcast %cst_11 : f32 to vector<16x128xf32>
    %15 = arith.subf %14, %13 : vector<16x128xf32>
    %16 = math.exp %15 : vector<16x128xf32>
    %cst_12 = arith.constant 1.000000e+00 : f32
    %17 = vector.broadcast %cst_12 : f32 to vector<16x128xf32>
    %18 = arith.addf %17, %16 : vector<16x128xf32>
    %cst_13 = arith.constant 1.000000e+00 : f32
    %19 = vector.broadcast %cst_13 : f32 to vector<16x128xf32>
    %20 = arith.divf %19, %18 : vector<16x128xf32>
    %c0_14 = arith.constant 0 : index
    %c0_15 = arith.constant 0 : index
    %21 = vector.load %arg6[%c0_14, %c0_15] : memref<16x128xf32, #tpu.memory_space<vmem>>, vector<16x128xf32>
    tpu.vector_store %arg6[%c0_14, %c0_15], %20 {strides = array<i32>} : memref<16x128xf32, #tpu.memory_space<vmem>>, vector<16x128xf32>,
    return
  }
  func.func @transform_0(%arg0: i32) -> (i32, i32) {
    %c0_i32 = arith.constant 0 : i32
    %c0_i32_0 = arith.constant 0 : i32
    return %arg0, %c0_i32 : i32, i32
  }
  func.func @transform_1(%arg0: i32) -> (i32, i32) {
    %c0_i32 = arith.constant 0 : i32
    %c0_i32_0 = arith.constant 0 : i32
    %c0_i32_1 = arith.constant 0 : i32
    return %c0_i32, %c0_i32_0 : i32, i32
  }
  func.func @transform_2(%arg0: i32) -> (i32, i32) {
    %c0_i32 = arith.constant 0 : i32
    %c0_i32_0 = arith.constant 0 : i32
    %c0_i32_1 = arith.constant 0 : i32
    return %c0_i32, %c0_i32_0 : i32, i32
  }
  func.func @transform_3(%arg0: i32) -> (i32, i32) {
    %c0_i32 = arith.constant 0 : i32
    %c0_i32_0 = arith.constant 0 : i32
    %c0_i32_1 = arith.constant 0 : i32
    return %c0_i32, %c0_i32_0 : i32, i32
  }
  func.func @transform_4(%arg0: i32) -> (i32, i32) {
    %c0_i32 = arith.constant 0 : i32
    %c0_i32_0 = arith.constant 0 : i32
    %c0_i32_1 = arith.constant 0 : i32
    return %c0_i32, %c0_i32_0 : i32, i32
  }
  func.func @transform_5(%arg0: i32) -> (i32, i32) {
    %c0_i32 = arith.constant 0 : i32
    %c0_i32_0 = arith.constant 0 : i32
    return %arg0, %c0_i32 : i32, i32
  }
}

</mosaic_0001>

<bundles_post_ra>
// kernel: tpu_custom_call.1
= control target key start
LH: loop header
LB: loop body
LE: loop exit
PB: predicated region body
PF: predicated region fallthrough
CT: control target
= control target key end

     0   :  { %10 = vsyncpa [#allocation3], 0  ;;  %s910_s0 = inlined_call_operand.hbm [shape: bf16[16,512], index: 0, kind: input, shape index: {}]   ;;  %s911_s1 = inlined_call_operand.hbm [shape: bf16[512,128], index: 1, kind: input, shape index: {}]   ;;  %s912_s2 = inlined_call_operand.vmem [shape: f32[1,128], index: 2, kind: input, shape index: {}]   ;;  %s913_s3 = inlined_call_operand.hbm [shape: bf16[128,128], index: 3, kind: input, shape index: {}]   ;;  %s914_s4 = inlined_call_operand.vmem [shape: f32[1,128], index: 4, kind: input, shape index: {}]   ;;  %s915_s5 = inlined_call_operand.hbm [shape: f32[16,128], index: 5, kind: output, shape index: {}]  }
   0x1   :  { %11 = vsyncpa [#allocation6], 0 }
   0x2   :  { %12 = vsyncpa [#allocation4], 0  ;;  %s850_s18 = smov [#allocation5]  }
   0x3   :  { %s30_s19 = sshll.u32 %s850_s18, 4  ;;  %s31_s19 = int_to_ptr.vmem [resolvable:$true] %s30_s19 }
   0x4   :  { %s772_s20 = scalar_lea.vmem %s31_s19, 4096  ;;  %p777_p1 = scmp.lt.s32.totalorder %s31_s19, %s31_s19 }
   0x5   :  { %p773_p0 = scmp.ne.s32.totalorder %s31_s19, %s772_s20  ;;  %p778_p2 = scmp.lt.s32.totalorder %s772_s20, %s772_s20 }
   0x7   :  { %p779_p3 = por %p778_p2, %p777_p1 }
   0x9   :  { %p780_p4 = pnand %p779_p3, %p773_p0 }
   0xb   :  { %783 = shalt.err (!%p780_p4)
}
   0xc   :  { %s851_s21 = smov 64   ;;  %s852_s22 = smov 4  }
   0xd   :  { %36 = dma.hbm_to_vmem [thread:$0]  %s911_s1, 4096, %s31_s19, [#allocation6], %s851_s21, %s851_s21, %s852_s22  }
   0xe   :  { %s853_s25 = smov [#allocation2]  }
   0xf   :  { %s18_s26 = sshll.u32 %s853_s25, 4  ;;  %s19_s26 = int_to_ptr.vmem [resolvable:$true] %s18_s26 }
  0x10   :  { %s792_s27 = scalar_lea.vmem %s19_s26, 512  ;;  %p797_p6 = scmp.lt.s32.totalorder %s19_s26, %s19_s26 }
  0x11   :  { %p793_p5 = scmp.ne.s32.totalorder %s19_s26, %s792_s27  ;;  %p798_p7 = scmp.lt.s32.totalorder %s792_s27, %s792_s27 }
  0x13   :  { %p799_p8 = por %p798_p7, %p797_p6 }
  0x15   :  { %p800_p9 = pnand %p799_p8, %p793_p5 }
  0x17   :  { %803 = shalt.err (!%p800_p9)
}
  0x18   :  { %s854_s28 = smov 256   ;;  %s855_s29 = smov 16  }
  0x19   :  { %24 = dma.hbm_to_vmem [thread:$0]  %s910_s0, 512, %s19_s26, [#allocation3], %s854_s28, %s854_s28, %s855_s29  }
  0x1a   :  { %s856_s7 = smov [#allocation7]  }
  0x1b   :  { %s44_s8 = sshll.u32 %s856_s7, 4  ;;  %s45_s8 = int_to_ptr.vmem [resolvable:$true] %s44_s8 }
  0x1c   :  { %s812_s1 = scalar_lea.vmem %s45_s8, 1024  ;;  %p817_p11 = scmp.lt.s32.totalorder %s45_s8, %s45_s8 }
  0x1d   :  { %p813_p10 = scmp.ne.s32.totalorder %s45_s8, %s812_s1  ;;  %p818_p12 = scmp.lt.s32.totalorder %s812_s1, %s812_s1 }
  0x1f   :  { %p819_p13 = por %p818_p12, %p817_p11 }
  0x21   :  { %p820_p0 = pnand %p819_p13, %p813_p10 }
  0x23   :  { %823 = shalt.err (!%p820_p0)
}
  0x24   :  { %50 = dma.hbm_to_vmem [thread:$0]  %s913_s3, 1024, %s45_s8, [#allocation6], %s851_s21, %s851_s21, %s852_s22  }
  0x25   :  { %844 = dma.done.wait [#allocation3], 512  }
  0x26   :  { %845 = vsyncadd [#allocation3], 4294966784 }
  0x27   :  { %846 = dma.done.wait [#allocation6], 5120  }
  0x28   :  { %847 = vsyncadd [#allocation6], 4294962176  ;;  %v710_v0 = vld [vmem:[#allocation5 + $0x78] sm:$0xff]   ;;  %v714_v4 = vld [vmem:[#allocation5 + $0x70] sm:$0xff]   ;;  %v857_v34 = vmov 0.0   ;;  %vm858_vm0 = vmmov 0  }
  0x29   :  { %v711_v1 = vld [vmem:[#allocation5 + $0xf8] sm:$0xff]   ;;  %625 = vmatprep.subr.bf16.mxu0 %v710_v0  ;;  %v715_v5 = vld [vmem:[#allocation5 + $0xf0] sm:$0xff]   ;;  %v718_v8 = vld [vmem:[#allocation5 + $0x68] sm:$0xff]  }
  0x2a   :  { %v712_v2 = vld [vmem:[#allocation5 + $0x38] sm:$0xff]   ;;  %647 = vmatprep.subr.bf16.mxu1 %v711_v1  ;;  %v716_v6 = vld [vmem:[#allocation5 + $0x30] sm:$0xff]   ;;  %v719_v9 = vld [vmem:[#allocation5 + $0xe8] sm:$0xff]  }
  0x2b   :  { %v713_v3 = vld [vmem:[#allocation5 + $0xb8] sm:$0xff]   ;;  %626 = vmatpush3.bf16.msra.mxu0 %v712_v2  ;;  %v717_v7 = vld [vmem:[#allocation5 + $0xb0] sm:$0xff]   ;;  %v720_v10 = vld [vmem:[#allocation5 + $0x28] sm:$0xff]  }
  0x2c   :  { %648 = vmatpush3.bf16.msra.mxu1 %v713_v3  ;;  %627 = vmatprep.subr.bf16.mxu0 %v714_v4  ;;  %v721_v11 = vld [vmem:[#allocation5 + $0xa8] sm:$0xff]   ;;  %v722_v12 = vld [vmem:[#allocation5 + $0x60] sm:$0xff]   ;;  %v726_v16 = vld [vmem:[#allocation5 + $0x58] sm:$0xff]  }
  0x2d   :  { %649 = vmatprep.subr.bf16.mxu1 %v715_v5  ;;  %v723_v13 = vld [vmem:[#allocation5 + $0xe0] sm:$0xff]   ;;  %v727_v17 = vld [vmem:[#allocation5 + $0xd8] sm:$0xff]   ;;  %v730_v20 = vld [vmem:[#allocation5 + $0x50] sm:$0xff]  }
  0x2e   :  { %v724_v14 = vld [vmem:[#allocation5 + $0x20] sm:$0xff]   ;;  %v728_v18 = vld [vmem:[#allocation5 + $0x18] sm:$0xff]   ;;  %v731_v21 = vld [vmem:[#allocation5 + $0xd0] sm:$0xff]  }
  0x2f   :  { %628 = vmatpush3.bf16.msra.mxu0 %v716_v6  ;;  %v725_v15 = vld [vmem:[#allocation5 + $0xa0] sm:$0xff]   ;;  %v729_v19 = vld [vmem:[#allocation5 + $0x98] sm:$0xff]   ;;  %v732_v22 = vld [vmem:[#allocation5 + $0x10] sm:$0xff]  }
  0x30   :  { %650 = vmatpush3.bf16.msra.mxu1 %v717_v7  ;;  %629 = vmatprep.subr.bf16.mxu0 %v718_v8  ;;  %v733_v23 = vld [vmem:[#allocation5 + $0x90] sm:$0xff]   ;;  %v734_v24 = vld [vmem:[#allocation5 + $0x48] sm:$0xff]   ;;  %v738_v28 = vld [vmem:[#allocation5 + $0x40] sm:$0xff]  }
  0x31   :  { %651 = vmatprep.subr.bf16.mxu1 %v719_v9  ;;  %v735_v25 = vld [vmem:[#allocation5 + $0xc8] sm:$0xff]   ;;  %v739_v29 = vld [vmem:[#allocation5 + $0xc0] sm:$0xff]   ;;  %v748_v37 = vld [vmem:[#allocation7 + $0x38] sm:$0xff]  }
  0x32   :  { %v736_v26 = vld [vmem:[#allocation5 + $0x8] sm:$0xff]   ;;  %v740_v30 = vld [vmem:[#allocation5] sm:$0xff]   ;;  %v749_v38 = vld [vmem:[#allocation7 + $0x30] sm:$0xff]  }
  0x33   :  { %630 = vmatpush3.bf16.msra.mxu0 %v720_v10  ;;  %v737_v27 = vld [vmem:[#allocation5 + $0x88] sm:$0xff]   ;;  %v741_v31 = vld [vmem:[#allocation5 + $0x80] sm:$0xff]   ;;  %v752_v41 = vld [vmem:[#allocation7 + $0x18] sm:$0xff]  }
  0x34   :  { %652 = vmatpush3.bf16.msra.mxu1 %v721_v11  ;;  %631 = vmatprep.subr.bf16.mxu0 %v722_v12  ;;  %v742_v32 = vld [vmem:[#allocation2] ss:$16 sps:$4 sm:$0xff]   ;;  %v744_v33 = vld [vmem:[#allocation2 + $0x4] ss:$16 sps:$4 sm:$0xff]   ;;  %v745_v35 = vld [vmem:[#allocation2 + $0x8] ss:$16 sps:$4 sm:$0xff]  }
  0x35   :  { %653 = vmatprep.subr.bf16.mxu1 %v723_v13  ;;  %v747_v36 = vld [vmem:[#allocation2 + $0xc] ss:$16 sps:$4 sm:$0xff]   ;;  %382 = vmatprep.mubr.bf16.mxu0 %v744_v33  ;;  %v751_v40 = vld [vmem:[#allocation7 + $0x20] sm:$0xff]   ;;  %v753_v42 = vld [vmem:[#allocation7 + $0x10] sm:$0xff]  }
  0x36   :  { %423 = vmatprep.mubr.bf16.mxu1 %v747_v36  ;;  %v750_v39 = vld [vmem:[#allocation7 + $0x28] sm:$0xff]   ;;  %v755_v44 = vld [vmem:[#allocation7] sm:$0xff]  }
  0x37   :  { %632 = vmatpush3.bf16.msra.mxu0 %v724_v14  ;;  %v754_v43 = vld [vmem:[#allocation7 + $0x8] sm:$0xff]   ;;  %v579_v47 = vld [vmem:[%s912_s2] ss:$0 sm:$0xff] }
  0x38   :  { %654 = vmatpush3.bf16.msra.mxu1 %v725_v15  ;;  %633 = vmatprep.subr.bf16.mxu0 %v726_v16  ;;  %v616_v1 = vld [vmem:[%s914_s4] ss:$0 sm:$0xff]  ;;  %s859_s4 = smov [#allocation8]  }
  0x39   :  { %655 = vmatprep.subr.bf16.mxu1 %v727_v17  ;;  %s566_s12 = sshll.u32 %s859_s4, 4  ;;  %s567_s12 = int_to_ptr.vmem [resolvable:$true] %s566_s12 }
  0x3a   :  { %s824_s13 = scalar_lea.vmem %s567_s12, 256  ;;  %p829_p2 = scmp.lt.s32.totalorder %s567_s12, %s567_s12 }
  0x3b   :  { %634 = vmatpush3.bf16.msra.mxu0 %v728_v18  ;;  %p825_p1 = scmp.ne.s32.totalorder %s567_s12, %s824_s13  ;;  %p830_p3 = scmp.lt.s32.totalorder %s824_s13, %s824_s13 }
  0x3c   :  { %656 = vmatpush3.bf16.msra.mxu1 %v729_v19  ;;  %635 = vmatprep.subr.bf16.mxu0 %v730_v20 }
  0x3d   :  { %657 = vmatprep.subr.bf16.mxu1 %v731_v21  ;;  %p831_p4 = por %p830_p3, %p829_p2 }
  0x3f   :  { %636 = vmatpush3.bf16.msra.mxu0 %v732_v22  ;;  %p832_p5 = pnand %p831_p4, %p825_p1 }
  0x40   :  { %658 = vmatpush3.bf16.msra.mxu1 %v733_v23  ;;  %637 = vmatprep.subr.bf16.mxu0 %v734_v24 }
  0x41   :  { %659 = vmatprep.subr.bf16.mxu1 %v735_v25 }
  0x43   :  { %638 = vmatpush3.bf16.msra.mxu0 %v736_v26 }
  0x44   :  { %660 = vmatpush3.bf16.msra.mxu1 %v737_v27  ;;  %639 = vmatprep.subr.bf16.mxu0 %v738_v28 }
  0x45   :  { %661 = vmatprep.subr.bf16.mxu1 %v739_v29 }
  0x47   :  { %640 = vmatpush3.bf16.msra.mxu0 %v740_v30 }
  0x48   :  { %662 = vmatpush3.bf16.msra.mxu1 %v741_v31  ;;  %678 = vmatprep.subr.bf16.mxu0 %v857_v34 }
  0x4a   :  { %383 = vmatmul.mubr.bf16.vlgmr.msra.gmra.mxu0 %v742_v32 }
  0x4b   :  { %424 = vmatmul.mubr.bf16.vlgmr.msra.gmra.mxu1 %v745_v35  ;;  %679 = vmatpush3.bf16.msra.mxu0 %v748_v37 }
  0x4c   :  { %680 = vmatprep.subr.bf16.mxu0 %v857_v34  ;;  %694 = vmatprep.mubr.msk.bf16.mxu0 %vm858_vm0, %v857_v34 }
  0x4f   :  { %681 = vmatpush3.bf16.msra.mxu0 %v749_v38 }
  0x50   :  { %682 = vmatprep.subr.bf16.mxu0 %v857_v34 }
  0x53   :  { %683 = vmatpush3.bf16.msra.mxu0 %v750_v39 }
  0x54   :  { %684 = vmatprep.subr.bf16.mxu0 %v857_v34 }
  0x57   :  { %685 = vmatpush3.bf16.msra.mxu0 %v751_v40 }
  0x58   :  { %686 = vmatprep.subr.bf16.mxu0 %v857_v34 }
  0x5b   :  { %687 = vmatpush3.bf16.msra.mxu0 %v752_v41 }
  0x5c   :  { %688 = vmatprep.subr.bf16.mxu0 %v857_v34 }
  0x5f   :  { %689 = vmatpush3.bf16.msra.mxu0 %v753_v42 }
  0x60   :  { %690 = vmatprep.subr.bf16.mxu0 %v857_v34 }
  0x63   :  { %691 = vmatpush3.bf16.msra.mxu0 %v754_v43 }
  0x64   :  { %692 = vmatprep.subr.bf16.mxu0 %v857_v34 }
  0x67   :  { %693 = vmatpush3.bf16.msra.mxu0 %v755_v44 }
 0x10a   :  { %v641_v45 = vpop.f32.mrf.mxu0 }
 0x10b   :  { %v663_v46 = vpop.f32.mrf.mxu1 }
 0x10c   :  { %v642_v48 = vpop.f32.mrf.mxu0 }
 0x10d   :  { %v643_v49 = vadd.f32 %v642_v48, %v641_v45  ;;  %v664_v50 = vpop.f32.mrf.mxu1 }
 0x10e   :  { %v644_v51 = vpop.f32.mrf.mxu0  ;;  %v665_v55 = vadd.f32 %v664_v50, %v663_v46 }
 0x10f   :  { %v385_v52 = vadd.f32 %v643_v49, %v579_v47  ;;  %v666_v53 = vpop.f32.mrf.mxu1 }
 0x110   :  { %v645_v54 = vpop.f32.mrf.mxu0 }
 0x111   :  { %v646_v56 = vadd.f32 %v645_v54, %v644_v51  ;;  %v667_v57 = vpop.f32.mrf.mxu1  ;;  %v426_v58 = vadd.f32 %v665_v55, %v385_v52 }
 0x112   :  { %v668_v60 = vadd.f32 %v667_v57, %v666_v53 }
 0x113   :  { %v388_v59 = vadd.f32 %v646_v56, %v579_v47  ;;  %v432_v62 = vmax.f32 %v426_v58, 0.0 }
 0x115   :  { %v429_v61 = vadd.f32 %v668_v60, %v388_v59 }
 0x117   :  { %v433_v63 = vmax.f32 %v429_v61, 0.0 }
 0x119   :  { %v434_v0 = vpack.c.bf16 %v433_v63, %v432_v62 }
 0x11b   :  { %695 = vmatmul.mubr.bf16.vlgmr.msra.gmra.mxu0 %v434_v0 }
 0x1db   :  { %v540_v2 = vpop.f32.mrf.mxu0 }
 0x1dc   :  { %v541_v3 = vadd.f32 %v616_v1, %v540_v2 }
 0x1dd   :  { %v696_v4 = vpop.f32.mrf.mxu0 }
 0x1de   :  { %v547_v5 = vsub.f32 0.0, %v541_v3 }
 0x1df   :  { %v543_v6 = vpop.f32.mrf.mxu0 }
 0x1e0   :  { %v549_v7 = vmul.f32 1.442695, %v547_v5  ;;  %v544_v8 = vadd.f32 %v616_v1, %v543_v6 }
 0x1e1   :  { %v697_v9 = vpop.f32.mrf.mxu0 }
 0x1e2   :  { %756 = vpow2.f32 %v549_v7  ;;  %v548_v10 = vsub.f32 0.0, %v544_v8 }
 0x1e4   :  { %v551_v11 = vmul.f32 1.442695, %v548_v10 }
 0x1e6   :  { %758 = vpow2.f32 %v551_v11 }
 0x1ef   :  { %v757_v12 = vpop.eup %756 }
 0x1f0   :  { %v553_v13 = vadd.f32 1.0, %v757_v12 }
 0x1f2   :  { %760 = vrcp.f32 %v553_v13 }
 0x1f3   :  { %v759_v14 = vpop.eup %758 }
 0x1f4   :  { %v554_v15 = vadd.f32 1.0, %v759_v14 }
 0x1f6   :  { %762 = vrcp.f32 %v554_v15 }
 0x1ff   :  { %v761_v16 = vpop.eup %760 }
 0x200   :  { %559 = vst [vmem:[#allocation8] sm:$0xff] %v761_v16 }
 0x203   :  { %v763_v17 = vpop.eup %762 }
 0x204   :  { %560 = vst [vmem:[#allocation8 + $0x8] sm:$0xff] %v763_v17 }
 0x205   :  { %835 = shalt.err (!%p832_p5)
}
 0x206   :  { %s860_s14 = smov 128   ;;  %s861_s15 = smov 8  }
 0x207   :  { %572 = dma.vmem_to_hbm [thread:$0]  %s567_s12, 256, %s915_s5, [#allocation4], %s860_s14, %s860_s14, %s861_s15  }
 0x208   :  { %848 = dma.done.wait [#allocation4], 256  }
 0x209   :  { %849 = vsyncadd [#allocation4], 4294967040 }
 0x20a   :  { %576 = vsyncpa [#allocation3], 1 }
 0x20b   :  { %577 = vsyncpa [#allocation6], 1 }
 0x20c   :  { %578 = vsyncpa [#allocation4], 1 }

</bundles_post_ra>
